<compile_context>
chip_gen: v7x
topology: tpu7x:2x2x1
jax: 0.10.0
libtpu: 0.0.40
codegen_flags: <defaults>
</compile_context>

<pallas_src>
import jax
import jax.numpy as jnp
from jax.experimental import pallas as pl
from jax.experimental.pallas import tpu as pltpu

LANE = 128       # lane width (last-dim alignment for the padded hidden dim)
MAX_TB = 1024    # max batch-tile rows (tiled-add data: 1024 ~ 86% HBM roofline)


def _round_up(x, m):
    return (x + m - 1) // m * m


def _cdiv(a, b):
    return (a + b - 1) // b


def mlp_kernel(x_ref, w1t_ref, b1_ref, w2t_ref, b2_ref, o_ref):
    # x:   (TB, d0)          (storage dtype: f32 or bf16)
    # w1t: (d0, d1p)         b1: (1, d1p)  f32
    # w2t: (d1p, d2)         b2: (1, d2)   f32
    x = x_ref[...]
    h = jnp.dot(x, w1t_ref[...], preferred_element_type=jnp.float32) + b1_ref[...]
    h = jnp.maximum(h, 0.0)                       # ReLU fused on f32 accumulator
    y = jnp.dot(h.astype(w2t_ref.dtype), w2t_ref[...],
                preferred_element_type=jnp.float32) + b2_ref[...]
    o_ref[...] = y.astype(o_ref.dtype)


def prepare_params(w1, b1, w2, b2, dtype=jnp.float32):
    """One-time conversion of PyTorch-layout Linear params to the kernel layout
    (pre-transposed, hidden dim padded to 128 lanes), outside the hot path.

    Only d1 is padded: the zero-padded hidden columns give ReLU(0 + 0) = 0 and
    then contribute nothing through the (zero-padded) second matmul, so the
    math is unchanged.  d0 and d2 stay at their logical widths to keep the
    activation / output HBM traffic minimal.  Biases stay f32.
    """
    d1, d0 = w1.shape
    d2 = w2.shape[0]
    d1p = _round_up(d1, LANE)

    w1t = jnp.zeros((d0, d1p), dtype).at[:, :d1].set(w1.T.astype(dtype))
    b1r = jnp.zeros((1, d1p), jnp.float32).at[0, :d1].set(b1.astype(jnp.float32))
    w2t = jnp.zeros((d1p, d2), dtype).at[:d1, :].set(w2.T.astype(dtype))
    b2r = b2.astype(jnp.float32).reshape(1, d2)
    return w1t, b1r, w2t, b2r


@jax.jit
def mlp_forward(x, w1t, b1r, w2t, b2r):
    """x: (B, d0) in f32 or bf16; params from prepare_params (same dtype as x
    for the weights).  Returns (B, d2) in x.dtype."""
    B, d0 = x.shape
    d1p = w1t.shape[1]
    d2 = w2t.shape[1]
    itemsize = jnp.dtype(x.dtype).itemsize
    sublane = 8 if itemsize == 4 else 16        # bf16 packs 16 rows per vreg

    # Batch tiling: no padding of B.  Small B -> single full-dim tile (legal
    # block).  Larger B -> >= 2 sublane-aligned tiles so the "parallel" grid
    # axis can shard across the 2 TensorCores on v7x; partial last block is
    # handled by Pallas (clamped input DMA, masked output write-back).
    if B <= 2 * sublane:
        TB = B
    else:
        TB = min(MAX_TB, _round_up(_cdiv(B, 2), sublane))
    grid = _cdiv(B, TB)

    flops = 2 * B * (d0 * d1p + d1p * d2)
    bytes_accessed = (itemsize * (B * d0 + B * d2 + d0 * d1p + d1p * d2)
                      + 4 * (d1p + d2))

    # Generous VMEM hint: 2x the actual buffer footprint + headroom, never
    # tighter than 16 MiB (so it only ever *raises* the scoped limit when the
    # problem grows), capped at 64 MiB (v7x physical VMEM).
    buf_bytes = (2 * TB * (d0 + d2) * itemsize          # double-buffered x / out tiles
                 + 2 * (d0 * d1p + d1p * d2) * itemsize  # resident weights (2 bufs)
                 + 2 * (d1p + d2) * 4                    # biases
                 + TB * d1p * 4)                         # f32 intermediate h
    vmem_limit = min(64 * 1024 * 1024,
                     max(16 * 1024 * 1024, 2 * buf_bytes + (4 << 20)))

    out = pl.pallas_call(
        mlp_kernel,
        out_shape=jax.ShapeDtypeStruct((B, d2), x.dtype),
        grid_spec=pltpu.PrefetchScalarGridSpec(
            num_scalar_prefetch=0,
            grid=(grid,),
            in_specs=[
                pl.BlockSpec((TB, d0), lambda i: (i, 0)),    # x tile (pipelined)
                pl.BlockSpec((d0, d1p), lambda i: (0, 0)),   # W1^T (resident)
                pl.BlockSpec((1, d1p), lambda i: (0, 0)),    # b1   (resident, f32)
                pl.BlockSpec((d1p, d2), lambda i: (0, 0)),   # W2^T (resident)
                pl.BlockSpec((1, d2), lambda i: (0, 0)),     # b2   (resident, f32)
            ],
            out_specs=pl.BlockSpec((TB, d2), lambda i: (i, 0)),
        ),
        compiler_params=pltpu.CompilerParams(
            dimension_semantics=("parallel",),   # batch tiles independent
            vmem_limit_bytes=int(vmem_limit),
        ),
        cost_estimate=pl.CostEstimate(
            flops=int(flops), transcendentals=0,
            bytes_accessed=int(bytes_accessed)),
    )(x, w1t, b1r, w2t, b2r)

    return out


def init_linear_params(key, in_features, out_features):
    """Deterministic init mimicking torch.nn.Linear (uniform +/- 1/sqrt(fan_in))."""
    k_w, k_b = jax.random.split(key)
    bound = 1.0 / jnp.sqrt(jnp.float32(in_features))
    w = jax.random.uniform(k_w, (out_features, in_features), jnp.float32,
                           minval=-bound, maxval=bound)
    b = jax.random.uniform(k_b, (out_features,), jnp.float32,
                           minval=-bound, maxval=bound)
    return w, b


if __name__ == "__main__":
    # dims = [32, 64, 16], small batch
    dims = (32, 64, 16)
    B = 8

    key = jax.random.PRNGKey(0)
    k_x, k_l1, k_l2 = jax.random.split(key, 3)

    x = jax.random.normal(k_x, (B, dims[0]), jnp.float32)
    w1, b1 = init_linear_params(k_l1, dims[0], dims[1])
    w2, b2 = init_linear_params(k_l2, dims[1], dims[2])

    # Pure-JAX reference (unpadded math)
    ref = jnp.maximum(x @ w1.T + b1, 0.0) @ w2.T + b2

    # --- f32 path (v5e-safe), checked tightly ---------------------------------
    w1t, b1r, w2t, b2r = prepare_params(w1, b1, w2, b2, dtype=jnp.float32)
    y = mlp_forward(x, w1t, b1r, w2t, b2r)
    y = jax.block_until_ready(y)
    assert y.shape == (B, dims[2])
    assert jnp.allclose(y, ref, atol=1e-5, rtol=1e-5)

    # --- bf16 storage path (v6e/v7x bandwidth win), f32 accumulation ----------
    w1t16, b1r16, w2t16, b2r16 = prepare_params(w1, b1, w2, b2, dtype=jnp.bfloat16)
    y16 = mlp_forward(x.astype(jnp.bfloat16), w1t16, b1r16, w2t16, b2r16)
    y16 = jax.block_until_ready(y16)
    assert y16.shape == (B, dims[2])
    assert jnp.allclose(y16.astype(jnp.float32), ref, atol=1e-1, rtol=1e-1)

    print("KERNEL_OK")
</pallas_src>

<mosaic_0001>
module attributes {stable_mosaic.version = 11 : i64} {
  func.func @mlp_kernel(%arg0: i32, %arg1: memref<8x32xf32, #tpu.memory_space<vmem>>, %arg2: memref<32x128xf32, #tpu.memory_space<vmem>>, %arg3: memref<1x128xf32, #tpu.memory_space<vmem>>, %arg4: memref<128x16xf32, #tpu.memory_space<vmem>>, %arg5: memref<1x16xf32, #tpu.memory_space<vmem>>, %arg6: memref<8x16xf32, #tpu.memory_space<vmem>>) attributes {dimension_semantics = [#tpu.dimension_semantics<parallel>], iteration_bounds = array<i64: 1>, scalar_prefetch = 0 : i64, scratch_operands = 0 : i64, tpu.core_type = #tpu.core_type<tc>, window_params = [{transform_indices = @transform_0, window_bounds = array<i64: 8, 32>}, {pipeline_mode = #tpu.pipeline_mode<synchronous>, transform_indices = @transform_1, window_bounds = array<i64: 32, 128>}, {pipeline_mode = #tpu.pipeline_mode<synchronous>, transform_indices = @transform_2, window_bounds = array<i64: 1, 128>}, {pipeline_mode = #tpu.pipeline_mode<synchronous>, transform_indices = @transform_3, window_bounds = array<i64: 128, 16>}, {pipeline_mode = #tpu.pipeline_mode<synchronous>, transform_indices = @transform_4, window_bounds = array<i64: 1, 16>}, {transform_indices = @transform_5, window_bounds = array<i64: 8, 16>}]} {
    %c0 = arith.constant 0 : index
    %c0_0 = arith.constant 0 : index
    %0 = vector.load %arg1[%c0, %c0_0] : memref<8x32xf32, #tpu.memory_space<vmem>>, vector<8x32xf32>
    %c0_1 = arith.constant 0 : index
    %c0_2 = arith.constant 0 : index
    %1 = vector.load %arg2[%c0_1, %c0_2] : memref<32x128xf32, #tpu.memory_space<vmem>>, vector<32x128xf32>
    %cst = arith.constant dense<0.000000e+00> : vector<8x128xf32>
    %2 = tpu.matmul %0, %1, %cst {dimension_numbers = #tpu.dot_dimension_numbers<[1], [0], [0], [1], [0, 0, 1, 1], [], []>} : vector<8x32xf32>, vector<32x128xf32>, vector<8x128xf32> -> vector<8x128xf32>
    %c0_3 = arith.constant 0 : index
    %c0_4 = arith.constant 0 : index
    %3 = vector.load %arg3[%c0_3, %c0_4] : memref<1x128xf32, #tpu.memory_space<vmem>>, vector<1x128xf32>
    %4 = vector.broadcast %3 : vector<1x128xf32> to vector<8x128xf32>
    %5 = arith.addf %2, %4 : vector<8x128xf32>
    %cst_5 = arith.constant 0.000000e+00 : f32
    %6 = vector.broadcast %cst_5 : f32 to vector<8x128xf32>
    %7 = arith.maximumf %5, %6 : vector<8x128xf32>
    %c0_6 = arith.constant 0 : index
    %c0_7 = arith.constant 0 : index
    %8 = vector.load %arg4[%c0_6, %c0_7] : memref<128x16xf32, #tpu.memory_space<vmem>>, vector<128x16xf32>
    %cst_8 = arith.constant dense<0.000000e+00> : vector<8x16xf32>
    %9 = tpu.matmul %7, %8, %cst_8 {dimension_numbers = #tpu.dot_dimension_numbers<[1], [0], [0], [1], [0, 0, 1, 1], [], []>} : vector<8x128xf32>, vector<128x16xf32>, vector<8x16xf32> -> vector<8x16xf32>
    %c0_9 = arith.constant 0 : index
    %c0_10 = arith.constant 0 : index
    %10 = vector.load %arg5[%c0_9, %c0_10] : memref<1x16xf32, #tpu.memory_space<vmem>>, vector<1x16xf32>
    %11 = vector.broadcast %10 : vector<1x16xf32> to vector<8x16xf32>
    %12 = arith.addf %9, %11 : vector<8x16xf32>
    %c0_11 = arith.constant 0 : index
    %c0_12 = arith.constant 0 : index
    %13 = vector.load %arg6[%c0_11, %c0_12] : memref<8x16xf32, #tpu.memory_space<vmem>>, vector<8x16xf32>
    tpu.vector_store %arg6[%c0_11, %c0_12], %12 {strides = array<i32>} : memref<8x16xf32, #tpu.memory_space<vmem>>, vector<8x16xf32>,
    return
  }
  func.func @transform_0(%arg0: i32) -> (i32, i32) {
    %c0_i32 = arith.constant 0 : i32
    %c0_i32_0 = arith.constant 0 : i32
    return %arg0, %c0_i32 : i32, i32
  }
  func.func @transform_1(%arg0: i32) -> (i32, i32) {
    %c0_i32 = arith.constant 0 : i32
    %c0_i32_0 = arith.constant 0 : i32
    %c0_i32_1 = arith.constant 0 : i32
    return %c0_i32, %c0_i32_0 : i32, i32
  }
  func.func @transform_2(%arg0: i32) -> (i32, i32) {
    %c0_i32 = arith.constant 0 : i32
    %c0_i32_0 = arith.constant 0 : i32
    %c0_i32_1 = arith.constant 0 : i32
    return %c0_i32, %c0_i32_0 : i32, i32
  }
  func.func @transform_3(%arg0: i32) -> (i32, i32) {
    %c0_i32 = arith.constant 0 : i32
    %c0_i32_0 = arith.constant 0 : i32
    %c0_i32_1 = arith.constant 0 : i32
    return %c0_i32, %c0_i32_0 : i32, i32
  }
  func.func @transform_4(%arg0: i32) -> (i32, i32) {
    %c0_i32 = arith.constant 0 : i32
    %c0_i32_0 = arith.constant 0 : i32
    %c0_i32_1 = arith.constant 0 : i32
    return %c0_i32, %c0_i32_0 : i32, i32
  }
  func.func @transform_5(%arg0: i32) -> (i32, i32) {
    %c0_i32 = arith.constant 0 : i32
    %c0_i32_0 = arith.constant 0 : i32
    return %arg0, %c0_i32 : i32, i32
  }
}

</mosaic_0001>

<bundles_post_ra>
// kernel: mlp_forward.1
= control target key start
LH: loop header
LB: loop body
LE: loop exit
PB: predicated region body
PF: predicated region fallthrough
CT: control target
= control target key end

     0   :  { %v346_v3 = vmov 0.0|0.0   ;;  %vm347_vm0 = vmmov 0   ;;  %v348_v6 = vmov 0.0   ;;  %s461_s0 = inlined_call_operand.vmem [shape: f32[8,32], index: 0, kind: input, shape index: {}]   ;;  %s462_s1 = inlined_call_operand.vmem [shape: f32[32,128], index: 1, kind: input, shape index: {}]   ;;  %s463_s2 = inlined_call_operand.vmem [shape: f32[1,128], index: 2, kind: input, shape index: {}]   ;;  %s464_s3 = inlined_call_operand.vmem [shape: f32[128,16], index: 3, kind: input, shape index: {}]   ;;  %s465_s4 = inlined_call_operand.vmem [shape: f32[1,16], index: 4, kind: input, shape index: {}]   ;;  %s466_s5 = inlined_call_operand.hbm [shape: f32[8,16], index: 5, kind: output, shape index: {}]  }
   0x1   :  { %v22_v0 = vld [vmem:[%s462_s1] sm:$0xff]  ;;  %v23_v1 = vld [vmem:[%s462_s1 + $0x8] sm:$0xff]  ;;  %v24_v2 = vld [vmem:[%s462_s1 + $0x10] sm:$0xff]  ;;  %288 = vmatprep.subr.bf16.mxu0 %v346_v3  ;;  %250 = vmatprep.mubr.msk.f32.mxu0 %vm347_vm0, %v348_v6 }
   0x2   :  { %v289_v4 = vpack.c.bf16 %v23_v1, %v22_v0  ;;  %v25_v5 = vld [vmem:[%s462_s1 + $0x18] sm:$0xff]  ;;  %v108_v7 = vld [vmem:[%s464_s3] sm:$0xff]  ;;  %294 = vmatprep.subr.bf16.mxu1 %v346_v3  ;;  %v109_v8 = vld [vmem:[%s464_s3 + $0x8] sm:$0xff]  ;;  %285 = vmatprep.mubr.msk.f32.mxu1 %vm347_vm0, %v348_v6 }
   0x3   :  { %v110_v9 = vld [vmem:[%s464_s3 + $0x10] sm:$0xff]  ;;  %v111_v10 = vld [vmem:[%s464_s3 + $0x18] sm:$0xff]  ;;  %v292_v11 = vpack.c.bf16 %v25_v5, %v24_v2  ;;  %v295_v12 = vpack.c.bf16 %v109_v8, %v108_v7  ;;  %v112_v14 = vld [vmem:[%s464_s3 + $0x20] sm:$0xff] }
   0x4   :  { %290 = vmatpush3.bf16.msra.mxu0 %v289_v4  ;;  %v298_v13 = vpack.c.bf16 %v111_v10, %v110_v9  ;;  %v113_v15 = vld [vmem:[%s464_s3 + $0x28] sm:$0xff] }
   0x5   :  { %291 = vmatprep.subr.bf16.mxu0 %v346_v3  ;;  %296 = vmatpush3.bf16.msra.mxu1 %v295_v12 }
   0x6   :  { %297 = vmatprep.subr.bf16.mxu1 %v346_v3 }
   0x7   :  { %10 = vsyncpa [#allocation3], 0  ;;  %v21_v16 = vld [vmem:[%s461_s0] sm:$0xff]  ;;  %vm33_vm1 = vcmask 261120   ;;  %v301_v17 = vpack.c.bf16 %v113_v15, %v112_v14  ;;  %v114_v18 = vld [vmem:[%s464_s3 + $0x30] sm:$0xff]  ;;  %s349_s11 = smov [#allocation2]  }
   0x8   :  { %293 = vmatpush3.bf16.msra.mxu0 %v292_v11  ;;  %v115_v19 = vld [vmem:[%s464_s3 + $0x38] sm:$0xff]  ;;  %v116_v21 = vld [vmem:[%s464_s3 + $0x40] sm:$0xff]  ;;  %v117_v22 = vld [vmem:[%s464_s3 + $0x48] sm:$0xff]  ;;  %s209_s12 = sshll.u32 %s349_s11, 4  ;;  %vm201_vm2 = vcmask 130048   ;;  %s210_s12 = int_to_ptr.vmem [resolvable:$true] %s209_s12 }
   0x9   :  { %299 = vmatpush3.bf16.msra.mxu1 %v298_v13  ;;  %v304_v20 = vpack.c.bf16 %v115_v19, %v114_v18  ;;  %v307_v23 = vpack.c.bf16 %v117_v22, %v116_v21  ;;  %v118_v24 = vld [vmem:[%s464_s3 + $0x50] sm:$0xff]  ;;  %v119_v25 = vld [vmem:[%s464_s3 + $0x58] sm:$0xff]  ;;  %v120_v27 = vld [vmem:[%s464_s3 + $0x60] sm:$0xff]  ;;  %p327_p1 = scmp.lt.s32.totalorder %s210_s12, %s210_s12 }
   0xa   :  { %300 = vmatprep.subr.bf16.mxu1 %v346_v3  ;;  %v310_v26 = vpack.c.bf16 %v119_v25, %v118_v24  ;;  %v121_v28 = vld [vmem:[%s464_s3 + $0x68] sm:$0xff]  ;;  %v122_v30 = vld [vmem:[%s464_s3 + $0x70] sm:$0xff]  ;;  %v123_v31 = vld [vmem:[%s464_s3 + $0x78] sm:$0xff]  ;;  %s322_s3 = scalar_lea.vmem %s210_s12, 128 }
   0xb   :  { %251 = vmatmul.mubr.msk.f32.vlgmr.msra.gmra.mrb[0].mxu0 %vm33_vm1, %v21_v16  ;;  %v313_v29 = vpack.c.bf16 %v121_v28, %v120_v27  ;;  %v316_v32 = vpack.c.bf16 %v123_v31, %v122_v30  ;;  %v217_v33 = vld [vmem:[%s463_s2] ss:$0 sm:$0xff]  ;;  %p323_p0 = scmp.ne.s32.totalorder %s210_s12, %s322_s3  ;;  %p328_p2 = scmp.lt.s32.totalorder %s322_s3, %s322_s3 }
   0xc   :  { %v219_v38 = vld [vmem:[%s465_s4] ss:$0 sm:$0xff] }
   0xd   :  { %302 = vmatpush3.bf16.msra.mxu1 %v301_v17  ;;  %p329_p3 = por %p328_p2, %p327_p1 }
   0xe   :  { %303 = vmatprep.subr.bf16.mxu1 %v346_v3 }
   0xf   :  { %p330_p4 = pnand %p329_p3, %p323_p0 }
  0x11   :  { %305 = vmatpush3.bf16.msra.mxu1 %v304_v20 }
  0x12   :  { %306 = vmatprep.subr.bf16.mxu1 %v346_v3 }
  0x15   :  { %308 = vmatpush3.bf16.msra.mxu1 %v307_v23 }
  0x16   :  { %309 = vmatprep.subr.bf16.mxu1 %v346_v3 }
  0x19   :  { %311 = vmatpush3.bf16.msra.mxu1 %v310_v26 }
  0x1a   :  { %312 = vmatprep.subr.bf16.mxu1 %v346_v3 }
  0x1d   :  { %314 = vmatpush3.bf16.msra.mxu1 %v313_v29 }
  0x1e   :  { %315 = vmatprep.subr.bf16.mxu1 %v346_v3 }
  0x21   :  { %317 = vmatpush3.bf16.msra.mxu1 %v316_v32 }
  0xde   :  { %v103_v34 = vpop.f32.mrb[0].mxu0 }
  0xdf   :  { %v104_v35 = vadd.f32 %v217_v33, %v103_v34  ;;  %v252_v36 = vpop.f32.mrb[1].mxu0 }
  0xe1   :  { %v107_v37 = vmax.f32 %v104_v35, 0.0 }
  0xe3   :  { %286 = vmatmul.mubr.f32.vlgmr.msra.gmra.mrb[0].mxu1 %v107_v37 }
 0x1b6   :  { %v197_v39 = vpop.f32.mrb[0].mxu1 }
 0x1b7   :  { %v198_v40 = vadd.f32 %v219_v38, %v197_v39  ;;  %v287_v41 = vpop.f32.mrb[1].mxu1 }
 0x1b9   :  { %202 = vst.msk [vmem:[#allocation2] sm:$0xff] %vm201_vm2, %v198_v40 }
 0x1ba   :  { %333 = shalt.err (!%p330_p4)
}
 0x1bb   :  { %s334_s14 = scalar_lea.hbm %s466_s5, 128 }
 0x1bc   :  { %p335_p5 = scmp.ne.s32.totalorder %s466_s5, %s334_s14  ;;  %p338_p6 = scmp.lt.u32.totalorder %s334_s14, %s466_s5 }
 0x1be   :  { %p340_p7 = pnand %p338_p6, %p335_p5 }
 0x1c0   :  { %343 = shalt.err (!%p340_p7)
}
 0x1c1   :  { %212 = dma.vmem_to_hbm [thread:$0]  %s210_s12, 128, %s466_s5, [#allocation3]  }
 0x1c2   :  { %344 = dma.done.wait [#allocation3], 128  }
 0x1c3   :  { %345 = vsyncadd [#allocation3], 4294967168 }
 0x1c4   :  { %216 = vsyncpa [#allocation3], 1 }

</bundles_post_ra>
